<compile_context>
chip_gen: v7x
topology: tpu7x:2x2x1
jax: 0.10.0
libtpu: 0.0.40
codegen_flags: <defaults>
</compile_context>

<pallas_src>
import jax
import jax.numpy as jnp
from jax.experimental import pallas as pl
from jax.experimental.pallas import tpu as pltpu


def _round_up(x, m):
    return (x + m - 1) // m * m


def text_classifier_kernel(ids_ref, fused_ref, bias_ref, out_ref, acc_ref):
    j = pl.program_id(1)                      # vocab-tile (reduction) index

    @pl.when(j == 0)
    def _init():
        acc_ref[...] = jnp.zeros_like(acc_ref)

    ids = ids_ref[...]                        # (TB, L) int32
    tb, seq_len = ids.shape
    tv = fused_ref.shape[0]

    # Local vocab ids covered by this tile: [j*TV, (j+1)*TV)
    vocab_iota = jax.lax.broadcasted_iota(jnp.int32, (tb, tv), 1) + j * tv

    # counts[b, v_local] = #{ l : ids[b, l] == j*TV + v_local }
    # Built with a fully-unrolled per-token loop -> intermediate bounded to one (TB, TV) tile,
    # never a (B, L, V) one-hot.  (For very long sequences make L a grid axis instead.)
    counts = jnp.zeros((tb, tv), dtype=fused_ref.dtype)
    for l in range(seq_len):
        tok = ids[:, l:l + 1]                 # (TB, 1), static lane slice
        counts = counts + (tok == vocab_iota).astype(fused_ref.dtype)

    # Single MXU matmul per tile: (TB, TV) @ (TV, C_pad) accumulated in f32.
    acc_ref[...] += jnp.dot(counts, fused_ref[...], preferred_element_type=jnp.float32)

    @pl.when(j == pl.num_programs(1) - 1)
    def _finalize():
        out_ref[...] = (acc_ref[...] + bias_ref[...]).astype(out_ref.dtype)


def prepare_text_classifier_params(embedding, fc_weight, fc_bias, padding_idx,
                                   param_dtype=jnp.float32, max_v_tile=512):
    """One-time parameter prep (run once, NOT per forward call).

    Zeroes the padding_idx row, folds the FC weight into the embedding table
    (fused = embedding @ fc_weight.T), and pads to lane-dense (128-multiple) shapes.
    On v6e/v7x, param_dtype=jnp.bfloat16 halves table traffic (accumulation stays f32).
    """
    V, E = embedding.shape
    C, E2 = fc_weight.shape
    assert E == E2 and fc_bias.shape == (C,)

    emb = embedding.astype(jnp.float32)
    emb = emb.at[padding_idx].set(0.0)                    # nn.Embedding(padding_idx=...) semantics
    fused = emb @ fc_weight.astype(jnp.float32).T         # (V, C)

    C_pad = _round_up(C, 128)
    TV = min(max_v_tile, _round_up(V, 128))               # vocab tile (rows of fused per step)
    V_pad = _round_up(V, TV)

    fused_p = jnp.zeros((V_pad, C_pad), param_dtype).at[:V, :C].set(fused.astype(param_dtype))
    bias_p = jnp.zeros((1, C_pad), jnp.float32).at[0, :C].set(fc_bias.astype(jnp.float32))
    return fused_p, bias_p, C


def text_classifier_forward(ids, fused_p, bias_p, num_classes):
    """ids: (B, L) int token ids; fused_p/bias_p from prepare_text_classifier_params."""
    B, L = ids.shape
    V_pad, C_pad = fused_p.shape
    TV = min(512, V_pad)
    assert V_pad % TV == 0

    # Batch tiling: big batches get 128-row MXU tiles; tiny batches just pad to a sublane multiple.
    if B >= 128:
        TB = 128
        B_pad = _round_up(B, TB)
    else:
        B_pad = _round_up(B, 8)
        TB = B_pad

    ids_p = jnp.zeros((B_pad, L), jnp.int32).at[:B].set(ids.astype(jnp.int32))

    grid = (B_pad // TB, V_pad // TV)         # vocab (reduction) axis last

    itemsize = jnp.dtype(fused_p.dtype).itemsize
    cost = pl.CostEstimate(
        flops=int(2 * B_pad * V_pad * C_pad + B_pad * L * V_pad),
        transcendentals=0,
        bytes_accessed=int(ids_p.size * 4 + fused_p.size * itemsize
                           + bias_p.size * 4 + B_pad * C_pad * 4),
    )

    out_padded = pl.pallas_call(
        text_classifier_kernel,
        out_shape=jax.ShapeDtypeStruct((B_pad, C_pad), jnp.float32),
        grid_spec=pltpu.PrefetchScalarGridSpec(
            num_scalar_prefetch=0,
            grid=grid,
            in_specs=[
                pl.BlockSpec((TB, L), lambda i, j: (i, 0)),
                pl.BlockSpec((TV, C_pad), lambda i, j: (j, 0)),
                pl.BlockSpec((1, C_pad), lambda i, j: (0, 0)),
            ],
            out_specs=pl.BlockSpec((TB, C_pad), lambda i, j: (i, 0)),
            scratch_shapes=[pltpu.VMEM((TB, C_pad), jnp.float32)],
        ),
        compiler_params=pltpu.CompilerParams(
            dimension_semantics=("parallel", "arbitrary")),
        cost_estimate=cost,
    )(ids_p, fused_p, bias_p)

    return out_padded[:B, :num_classes]


def reference_forward(ids, embedding, fc_weight, fc_bias, padding_idx):
    emb = embedding.at[padding_idx].set(0.0)
    x = jnp.take(emb, ids, axis=0)            # (B, L, E)
    x = jnp.sum(x, axis=1)                    # (B, E)
    return x @ fc_weight.T + fc_bias          # (B, C)


if __name__ == "__main__":
    # Module hyperparameters (small, consistent with the forward pass)
    vocab_size = 32
    embed_dim = 16
    num_classes = 4
    padding_idx = 0
    batch = 2
    seq_len = 8

    key = jax.random.PRNGKey(0)
    k_emb, k_w, k_b, k_ids = jax.random.split(key, 4)

    # Deterministic synthetic parameters (nn.Embedding / nn.Linear shapes)
    embedding = jax.random.normal(k_emb, (vocab_size, embed_dim), dtype=jnp.float32)
    bound = 1.0 / (embed_dim ** 0.5)
    fc_weight = jax.random.uniform(k_w, (num_classes, embed_dim), jnp.float32, -bound, bound)
    fc_bias = jax.random.uniform(k_b, (num_classes,), jnp.float32, -bound, bound)

    # Example input: token ids, including some padding tokens
    ids = jax.random.randint(k_ids, (batch, seq_len), 0, vocab_size, dtype=jnp.int32)
    ids = ids.at[:, -2:].set(padding_idx)

    # One-time parameter prep (fold FC into the table, pad, zero padding row)
    fused_p, bias_p, _ = prepare_text_classifier_params(
        embedding, fc_weight, fc_bias, padding_idx)

    out = text_classifier_forward(ids, fused_p, bias_p, num_classes)
    out = jax.block_until_ready(out)

    ref = reference_forward(ids, embedding, fc_weight, fc_bias, padding_idx)
    assert out.shape == (batch, num_classes)
    assert jnp.allclose(out, ref, atol=1e-5, rtol=1e-5), (out, ref)

    print("KERNEL_OK")
</pallas_src>

<mosaic_0001>
module attributes {stable_mosaic.version = 11 : i64} {
  func.func @text_classifier_kernel(%arg0: i32, %arg1: i32, %arg2: memref<8x8xi32, #tpu.memory_space<vmem>>, %arg3: memref<128x128xf32, #tpu.memory_space<vmem>>, %arg4: memref<1x128xf32, #tpu.memory_space<vmem>>, %arg5: memref<8x128xf32, #tpu.memory_space<vmem>>, %arg6: memref<8x128xf32, #tpu.memory_space<vmem>>) attributes {dimension_semantics = [#tpu.dimension_semantics<parallel>, #tpu.dimension_semantics<arbitrary>], iteration_bounds = array<i64: 1, 1>, scalar_prefetch = 0 : i64, scratch_operands = 1 : i64, tpu.core_type = #tpu.core_type<tc>, window_params = [{transform_indices = @transform_0, window_bounds = array<i64: 8, 8>}, {transform_indices = @transform_1, window_bounds = array<i64: 128, 128>}, {pipeline_mode = #tpu.pipeline_mode<synchronous>, transform_indices = @transform_2, window_bounds = array<i64: 1, 128>}, {transform_indices = @transform_3, window_bounds = array<i64: 8, 128>}]} {
    %c0_i32 = arith.constant 0 : i32
    %0 = arith.cmpi eq, %arg1, %c0_i32 : i32
    %1 = arith.extui %0 : i1 to i32
    %c0_i32_0 = arith.constant 0 : i32
    %2 = arith.cmpi ne, %1, %c0_i32_0 : i32
    scf.if %2 {
      %cst_11 = arith.constant 0.000000e+00 : f32
      %65 = vector.broadcast %cst_11 : f32 to vector<8x128xf32>
      %c0_12 = arith.constant 0 : index
      %c0_13 = arith.constant 0 : index
      %66 = vector.load %arg6[%c0_12, %c0_13] : memref<8x128xf32, #tpu.memory_space<vmem>>, vector<8x128xf32>
      tpu.vector_store %arg6[%c0_12, %c0_13], %65 {strides = array<i32>} : memref<8x128xf32, #tpu.memory_space<vmem>>, vector<8x128xf32>,
    } else {
    }
    %c0 = arith.constant 0 : index
    %c0_1 = arith.constant 0 : index
    %3 = vector.load %arg2[%c0, %c0_1] : memref<8x8xi32, #tpu.memory_space<vmem>>, vector<8x8xi32>
    %4 = tpu.iota {dimensions = array<i32: 1>} : vector<8x128xi32>
    %c128_i32 = arith.constant 128 : i32
    %5 = arith.muli %arg1, %c128_i32 : i32
    %6 = vector.broadcast %5 : i32 to vector<8x128xi32>
    %7 = arith.addi %4, %6 : vector<8x128xi32>
    %cst = arith.constant 0.000000e+00 : f32
    %8 = vector.broadcast %cst : f32 to vector<8x128xf32>
    %9 = vector.extract_strided_slice %3 {offsets = [0, 0], sizes = [8, 1], strides = [1, 1]} : vector<8x8xi32> to vector<8x1xi32>
    %10 = vector.broadcast %9 : vector<8x1xi32> to vector<8x128xi32>
    %11 = arith.cmpi eq, %10, %7 : vector<8x128xi32>
    %12 = arith.extui %11 : vector<8x128xi1> to vector<8x128xi32>
    %13 = arith.sitofp %12 : vector<8x128xi32> to vector<8x128xf32>
    %14 = arith.addf %8, %13 : vector<8x128xf32>
    %15 = vector.extract_strided_slice %3 {offsets = [0, 1], sizes = [8, 1], strides = [1, 1]} : vector<8x8xi32> to vector<8x1xi32>
    %16 = vector.broadcast %15 : vector<8x1xi32> to vector<8x128xi32>
    %17 = arith.cmpi eq, %16, %7 : vector<8x128xi32>
    %18 = arith.extui %17 : vector<8x128xi1> to vector<8x128xi32>
    %19 = arith.sitofp %18 : vector<8x128xi32> to vector<8x128xf32>
    %20 = arith.addf %14, %19 : vector<8x128xf32>
    %21 = vector.extract_strided_slice %3 {offsets = [0, 2], sizes = [8, 1], strides = [1, 1]} : vector<8x8xi32> to vector<8x1xi32>
    %22 = vector.broadcast %21 : vector<8x1xi32> to vector<8x128xi32>
    %23 = arith.cmpi eq, %22, %7 : vector<8x128xi32>
    %24 = arith.extui %23 : vector<8x128xi1> to vector<8x128xi32>
    %25 = arith.sitofp %24 : vector<8x128xi32> to vector<8x128xf32>
    %26 = arith.addf %20, %25 : vector<8x128xf32>
    %27 = vector.extract_strided_slice %3 {offsets = [0, 3], sizes = [8, 1], strides = [1, 1]} : vector<8x8xi32> to vector<8x1xi32>
    %28 = vector.broadcast %27 : vector<8x1xi32> to vector<8x128xi32>
    %29 = arith.cmpi eq, %28, %7 : vector<8x128xi32>
    %30 = arith.extui %29 : vector<8x128xi1> to vector<8x128xi32>
    %31 = arith.sitofp %30 : vector<8x128xi32> to vector<8x128xf32>
    %32 = arith.addf %26, %31 : vector<8x128xf32>
    %33 = vector.extract_strided_slice %3 {offsets = [0, 4], sizes = [8, 1], strides = [1, 1]} : vector<8x8xi32> to vector<8x1xi32>
    %34 = vector.broadcast %33 : vector<8x1xi32> to vector<8x128xi32>
    %35 = arith.cmpi eq, %34, %7 : vector<8x128xi32>
    %36 = arith.extui %35 : vector<8x128xi1> to vector<8x128xi32>
    %37 = arith.sitofp %36 : vector<8x128xi32> to vector<8x128xf32>
    %38 = arith.addf %32, %37 : vector<8x128xf32>
    %39 = vector.extract_strided_slice %3 {offsets = [0, 5], sizes = [8, 1], strides = [1, 1]} : vector<8x8xi32> to vector<8x1xi32>
    %40 = vector.broadcast %39 : vector<8x1xi32> to vector<8x128xi32>
    %41 = arith.cmpi eq, %40, %7 : vector<8x128xi32>
    %42 = arith.extui %41 : vector<8x128xi1> to vector<8x128xi32>
    %43 = arith.sitofp %42 : vector<8x128xi32> to vector<8x128xf32>
    %44 = arith.addf %38, %43 : vector<8x128xf32>
    %45 = vector.extract_strided_slice %3 {offsets = [0, 6], sizes = [8, 1], strides = [1, 1]} : vector<8x8xi32> to vector<8x1xi32>
    %46 = vector.broadcast %45 : vector<8x1xi32> to vector<8x128xi32>
    %47 = arith.cmpi eq, %46, %7 : vector<8x128xi32>
    %48 = arith.extui %47 : vector<8x128xi1> to vector<8x128xi32>
    %49 = arith.sitofp %48 : vector<8x128xi32> to vector<8x128xf32>
    %50 = arith.addf %44, %49 : vector<8x128xf32>
    %51 = vector.extract_strided_slice %3 {offsets = [0, 7], sizes = [8, 1], strides = [1, 1]} : vector<8x8xi32> to vector<8x1xi32>
    %52 = vector.broadcast %51 : vector<8x1xi32> to vector<8x128xi32>
    %53 = arith.cmpi eq, %52, %7 : vector<8x128xi32>
    %54 = arith.extui %53 : vector<8x128xi1> to vector<8x128xi32>
    %55 = arith.sitofp %54 : vector<8x128xi32> to vector<8x128xf32>
    %56 = arith.addf %50, %55 : vector<8x128xf32>
    %c0_2 = arith.constant 0 : index
    %c0_3 = arith.constant 0 : index
    %57 = vector.load %arg6[%c0_2, %c0_3] : memref<8x128xf32, #tpu.memory_space<vmem>>, vector<8x128xf32>
    %c0_4 = arith.constant 0 : index
    %c0_5 = arith.constant 0 : index
    %58 = vector.load %arg3[%c0_4, %c0_5] : memref<128x128xf32, #tpu.memory_space<vmem>>, vector<128x128xf32>
    %cst_6 = arith.constant dense<0.000000e+00> : vector<8x128xf32>
    %59 = tpu.matmul %56, %58, %cst_6 {dimension_numbers = #tpu.dot_dimension_numbers<[1], [0], [0], [1], [0, 0, 1, 1], [], []>} : vector<8x128xf32>, vector<128x128xf32>, vector<8x128xf32> -> vector<8x128xf32>
    %60 = arith.addf %57, %59 : vector<8x128xf32>
    %c0_7 = arith.constant 0 : index
    %c0_8 = arith.constant 0 : index
    %61 = vector.load %arg6[%c0_7, %c0_8] : memref<8x128xf32, #tpu.memory_space<vmem>>, vector<8x128xf32>
    tpu.vector_store %arg6[%c0_7, %c0_8], %60 {strides = array<i32>} : memref<8x128xf32, #tpu.memory_space<vmem>>, vector<8x128xf32>,
    %c0_i32_9 = arith.constant 0 : i32
    %62 = arith.cmpi eq, %arg1, %c0_i32_9 : i32
    %63 = arith.extui %62 : i1 to i32
    %c0_i32_10 = arith.constant 0 : i32
    %64 = arith.cmpi ne, %63, %c0_i32_10 : i32
    scf.if %64 {
      %c0_11 = arith.constant 0 : index
      %c0_12 = arith.constant 0 : index
      %65 = vector.load %arg6[%c0_11, %c0_12] : memref<8x128xf32, #tpu.memory_space<vmem>>, vector<8x128xf32>
      %c0_13 = arith.constant 0 : index
      %c0_14 = arith.constant 0 : index
      %66 = vector.load %arg4[%c0_13, %c0_14] : memref<1x128xf32, #tpu.memory_space<vmem>>, vector<1x128xf32>
      %67 = vector.broadcast %66 : vector<1x128xf32> to vector<8x128xf32>
      %68 = arith.addf %65, %67 : vector<8x128xf32>
      %c0_15 = arith.constant 0 : index
      %c0_16 = arith.constant 0 : index
      %69 = vector.load %arg5[%c0_15, %c0_16] : memref<8x128xf32, #tpu.memory_space<vmem>>, vector<8x128xf32>
      tpu.vector_store %arg5[%c0_15, %c0_16], %68 {strides = array<i32>} : memref<8x128xf32, #tpu.memory_space<vmem>>, vector<8x128xf32>,
    } else {
    }
    return
  }
  func.func @transform_0(%arg0: i32, %arg1: i32) -> (i32, i32) {
    %c0_i32 = arith.constant 0 : i32
    %c0_i32_0 = arith.constant 0 : i32
    return %arg0, %c0_i32 : i32, i32
  }
  func.func @transform_1(%arg0: i32, %arg1: i32) -> (i32, i32) {
    %c0_i32 = arith.constant 0 : i32
    %c0_i32_0 = arith.constant 0 : i32
    return %arg1, %c0_i32 : i32, i32
  }
  func.func @transform_2(%arg0: i32, %arg1: i32) -> (i32, i32) {
    %c0_i32 = arith.constant 0 : i32
    %c0_i32_0 = arith.constant 0 : i32
    %c0_i32_1 = arith.constant 0 : i32
    return %c0_i32, %c0_i32_0 : i32, i32
  }
  func.func @transform_3(%arg0: i32, %arg1: i32) -> (i32, i32) {
    %c0_i32 = arith.constant 0 : i32
    %c0_i32_0 = arith.constant 0 : i32
    return %arg0, %c0_i32 : i32, i32
  }
}

</mosaic_0001>

<bundles_post_ra>
// kernel: tpu_custom_call.1
= control target key start
LH: loop header
LB: loop body
LE: loop exit
PB: predicated region body
PF: predicated region fallthrough
CT: control target
= control target key end

     0   :  { %8 = vsyncpa [#allocation4], 0  ;;  %s498_s0 = inlined_call_operand.hbm [shape: s32[8,8], index: 0, kind: input, shape index: {}]   ;;  %s499_s1 = inlined_call_operand.hbm [shape: f32[128,128], index: 1, kind: input, shape index: {}]   ;;  %s500_s2 = inlined_call_operand.vmem [shape: f32[1,128], index: 2, kind: input, shape index: {}]   ;;  %s501_s3 = inlined_call_operand.hbm [shape: f32[8,128], index: 3, kind: output, shape index: {}]  }
   0x1   :  { %9 = vsyncpa [#allocation7], 0 }
   0x2   :  { %10 = vsyncpa [#allocation5], 0  ;;  %s408_s12 = smov [#allocation3]   ;;  %s409_s14 = smov [#allocation6]  }
   0x3   :  { %s17_s13 = sshll.u32 %s408_s12, 4  ;;  %s26_s15 = sshll.u32 %s409_s14, 4  ;;  %s18_s13 = int_to_ptr.vmem [resolvable:$true] %s17_s13  ;;  %s444_s15 = int_to_ptr.vmem [resolvable:$true] %s26_s15 }
   0x4   :  { %s336_s18 = scalar_lea.hbm %s498_s0, 128 }
   0x5   :  { %p337_p0 = scmp.ne.s32.totalorder %s498_s0, %s336_s18  ;;  %p340_p1 = scmp.lt.u32.totalorder %s336_s18, %s498_s0 }
   0x7   :  { %p342_p2 = pnand %p340_p1, %p337_p0 }
   0x9   :  { %345 = shalt.err (!%p342_p2)
}
   0xa   :  { %s346_s23 = scalar_lea.vmem %s18_s13, 128  ;;  %p351_p4 = scmp.lt.s32.totalorder %s18_s13, %s18_s13 }
   0xb   :  { %p347_p3 = scmp.ne.s32.totalorder %s18_s13, %s346_s23  ;;  %p352_p5 = scmp.lt.s32.totalorder %s346_s23, %s346_s23 }
   0xd   :  { %p353_p6 = por %p352_p5, %p351_p4 }
   0xf   :  { %p354_p7 = pnand %p353_p6, %p347_p3 }
  0x11   :  { %357 = shalt.err (!%p354_p7)
}
  0x12   :  { %20 = dma.hbm_to_vmem [thread:$0]  %s498_s0, 128, %s18_s13, [#allocation4]  }
  0x13   :  { %s358_s28 = scalar_lea.hbm %s499_s1, 2048 }
  0x14   :  { %p359_p8 = scmp.ne.s32.totalorder %s499_s1, %s358_s28  ;;  %p362_p9 = scmp.lt.u32.totalorder %s358_s28, %s499_s1 }
  0x16   :  { %p364_p10 = pnand %p362_p9, %p359_p8 }
  0x18   :  { %367 = shalt.err (!%p364_p10)
}
  0x19   :  { %s368_s6 = scalar_lea.vmem %s444_s15, 2048  ;;  %p373_p12 = scmp.lt.s32.totalorder %s444_s15, %s444_s15 }
  0x1a   :  { %p369_p11 = scmp.ne.s32.totalorder %s444_s15, %s368_s6  ;;  %p374_p13 = scmp.lt.s32.totalorder %s368_s6, %s368_s6 }
  0x1c   :  { %p375_p0 = por %p374_p13, %p373_p12 }
  0x1e   :  { %p376_p1 = pnand %p375_p0, %p369_p11 }
  0x20   :  { %379 = shalt.err (!%p376_p1)
}
  0x21   :  { %s410_s0 = smov 128   ;;  %s411_s7 = smov 8  }
  0x22   :  { %32 = dma.hbm_to_vmem [thread:$0]  %s499_s1, 2048, %s444_s15, [#allocation7], %s410_s0, %s410_s0, %s411_s7  }
  0x23   :  { %402 = dma.done.wait [#allocation4], 128  }
  0x24   :  { %403 = vsyncadd [#allocation4], 4294967168 }
  0x25   :  { %404 = dma.done.wait [#allocation7], 2048  }
  0x26   :  { %405 = vsyncadd [#allocation7], 4294965248  ;;  %v412_v0 = vmov 2   ;;  %v413_v1 = vmov 0   ;;  %v414_v2 = vmov 0.0|0.0   ;;  %v46_v3 = vld [vmem:[#allocation3] sm:$0xff]  ;;  %v47_v35 = vlaneseq }
  0x27   :  { %329 = vset.pattern.permute.xlu1 %v412_v0  ;;  %327 = vset.pattern.permute.xlu0 %v413_v1  ;;  %v109_v4 = vld [vmem:[#allocation6] sm:$0xff]  ;;  %v110_v5 = vld [vmem:[#allocation6 + $0x8] sm:$0xff]  ;;  %v111_v7 = vld [vmem:[#allocation6 + $0x10] sm:$0xff]  ;;  %v415_v10 = vmov 3   ;;  %v416_v11 = vmov 1   ;;  %v417_v17 = vmov 4  }
  0x28   :  { %287 = vmatprep.subr.bf16.mxu0 %v414_v2  ;;  %67 = vperm.xlu1 %329, %v46_v3   ;;  %v288_v6 = vpack.c.bf16 %v110_v5, %v109_v4  ;;  %v112_v8 = vld [vmem:[#allocation6 + $0x18] sm:$0xff]  ;;  %v113_v12 = vld [vmem:[#allocation6 + $0x20] sm:$0xff]  ;;  %v114_v13 = vld [vmem:[#allocation6 + $0x28] sm:$0xff]  ;;  %v418_v18 = vmov 5   ;;  %v419_v22 = vmov 6   ;;  %v420_v23 = vmov 7  }
  0x29   :  { %53 = vperm.xlu0 %327, %v46_v3   ;;  %v291_v9 = vpack.c.bf16 %v112_v8, %v111_v7  ;;  %v294_v14 = vpack.c.bf16 %v114_v13, %v113_v12  ;;  %v115_v15 = vld [vmem:[#allocation6 + $0x30] sm:$0xff]  ;;  %v116_v16 = vld [vmem:[#allocation6 + $0x38] sm:$0xff]  ;;  %v117_v20 = vld [vmem:[#allocation6 + $0x40] sm:$0xff]  ;;  %vm421_vm0 = vmmov 0   ;;  %v422_v31 = vmov 0.0   ;;  %s423_s11 = smov [#allocation8]  }
  0x2a   :  { %289 = vmatpush3.bf16.msra.mxu0 %v288_v6  ;;  %v297_v19 = vpack.c.bf16 %v116_v16, %v115_v15  ;;  %v118_v21 = vld [vmem:[#allocation6 + $0x48] sm:$0xff]  ;;  %v119_v25 = vld [vmem:[#allocation6 + $0x50] sm:$0xff]  ;;  %v120_v26 = vld [vmem:[#allocation6 + $0x58] sm:$0xff]  ;;  %284 = vmatprep.mubr.msk.f32.mxu0 %vm421_vm0, %v422_v31  ;;  %v48_v38 = vand.u32 127, %v47_v35  ;;  %s216_s12 = sshll.u32 %s423_s11, 4  ;;  %s217_s12 = int_to_ptr.vmem [resolvable:$true] %s216_s12 }
  0x2b   :  { %290 = vmatprep.subr.bf16.mxu0 %v414_v2  ;;  %v300_v24 = vpack.c.bf16 %v118_v21, %v117_v20  ;;  %v303_v27 = vpack.c.bf16 %v120_v26, %v119_v25  ;;  %v121_v28 = vld [vmem:[#allocation6 + $0x60] sm:$0xff]  ;;  %v122_v29 = vld [vmem:[#allocation6 + $0x68] sm:$0xff]  ;;  %v123_v32 = vld [vmem:[#allocation6 + $0x70] sm:$0xff]  ;;  %s380_s13 = scalar_lea.vmem %s217_s12, 128  ;;  %p385_p3 = scmp.lt.s32.totalorder %s217_s12, %s217_s12 }
  0x2c   :  { %330 = vset.pattern.permute.xlu1 %v415_v10  ;;  %v306_v30 = vpack.c.bf16 %v122_v29, %v121_v28  ;;  %v124_v33 = vld [vmem:[#allocation6 + $0x78] sm:$0xff]  ;;  %p381_p2 = scmp.ne.s32.totalorder %s217_s12, %s380_s13  ;;  %p386_p4 = scmp.lt.s32.totalorder %s380_s13, %s380_s13 }
  0x2d   :  { %328 = vset.pattern.permute.xlu0 %v416_v11  ;;  %74 = vperm.xlu1 %330, %v46_v3   ;;  %v309_v34 = vpack.c.bf16 %v124_v33, %v123_v32  ;;  %v234_v60 = vld [vmem:[%s500_s2] ss:$0 sm:$0xff] }
  0x2e   :  { %60 = vperm.xlu0 %328, %v46_v3   ;;  %292 = vmatpush3.bf16.msra.mxu0 %v291_v9  ;;  %p387_p5 = por %p386_p4, %p385_p3 }
  0x2f   :  { %293 = vmatprep.subr.bf16.mxu0 %v414_v2 }
  0x30   :  { %p388_p6 = pnand %p387_p5, %p381_p2 }
  0x31   :  { %331 = vset.pattern.permute.xlu1 %v417_v17 }
  0x32   :  { %332 = vset.pattern.permute.xlu0 %v418_v18  ;;  %81 = vperm.xlu1 %331, %v46_v3  }
  0x33   :  { %88 = vperm.xlu0 %332, %v46_v3   ;;  %295 = vmatpush3.bf16.msra.mxu0 %v294_v14 }
  0x34   :  { %296 = vmatprep.subr.bf16.mxu0 %v414_v2 }
  0x36   :  { %333 = vset.pattern.permute.xlu1 %v419_v22 }
  0x37   :  { %335 = vset.pattern.permute.xlu0 %v420_v23  ;;  %95 = vperm.xlu1 %333, %v46_v3  }
  0x38   :  { %298 = vmatpush3.bf16.msra.mxu0 %v297_v19 }
  0x39   :  { %299 = vmatprep.subr.bf16.mxu0 %v414_v2 }
  0x3b   :  { %334 = vset.pattern.permute.xlu1 %v420_v23 }
  0x3c   :  { %301 = vmatpush3.bf16.msra.mxu0 %v300_v24  ;;  %102 = vperm.xlu1 %334, %v46_v3  }
  0x3d   :  { %302 = vmatprep.subr.bf16.mxu0 %v414_v2 }
  0x40   :  { %304 = vmatpush3.bf16.msra.mxu0 %v303_v27 }
  0x41   :  { %305 = vmatprep.subr.bf16.mxu0 %v414_v2 }
  0x44   :  { %307 = vmatpush3.bf16.msra.mxu0 %v306_v30 }
  0x45   :  { %308 = vmatprep.subr.bf16.mxu0 %v414_v2 }
  0x48   :  { %310 = vmatpush3.bf16.msra.mxu0 %v309_v34 }
  0xa7   :  { %v68_v36 = vpop.permute.xlu1 %67 }
  0xa8   :  { %v54_v37 = vpop.permute.xlu0 %53  ;;  %vm69_vm2 = vcmp.eq.s32.totalorder %v68_v36, %v48_v38 }
  0xa9   :  { %vm55_vm1 = vcmp.eq.s32.totalorder %v54_v37, %v48_v38  ;;  %v228_v44 = vsel %vm69_vm2, 1.0, %v422_v31 }
  0xaa   :  { %v226_v41 = vsel %vm55_vm1, 1.0, %v422_v31 }
  0xac   :  { %v75_v39 = vpop.permute.xlu1 %74 }
  0xad   :  { %v61_v40 = vpop.permute.xlu0 %60  ;;  %vm76_vm4 = vcmp.eq.s32.totalorder %v75_v39, %v48_v38 }
  0xae   :  { %vm62_vm3 = vcmp.eq.s32.totalorder %v61_v40, %v48_v38  ;;  %v229_v48 = vsel %vm76_vm4, 1.0, %v422_v31 }
  0xaf   :  { %v227_v42 = vsel %vm62_vm3, 1.0, %v422_v31 }
  0xb0   :  { %v65_v43 = vadd.f32 %v227_v42, %v226_v41 }
  0xb1   :  { %v82_v46 = vpop.permute.xlu1 %81 }
  0xb2   :  { %v72_v45 = vadd.f32 %v228_v44, %v65_v43  ;;  %v89_v47 = vpop.permute.xlu0 %88  ;;  %vm83_vm5 = vcmp.eq.s32.totalorder %v82_v46, %v48_v38 }
  0xb3   :  { %vm90_vm6 = vcmp.eq.s32.totalorder %v89_v47, %v48_v38  ;;  %v230_v50 = vsel %vm83_vm5, 1.0, %v422_v31 }
  0xb4   :  { %v79_v49 = vadd.f32 %v229_v48, %v72_v45  ;;  %v231_v52 = vsel %vm90_vm6, 1.0, %v422_v31 }
  0xb6   :  { %v86_v51 = vadd.f32 %v230_v50, %v79_v49  ;;  %v96_v53 = vpop.permute.xlu1 %95 }
  0xb7   :  { %vm97_vm7 = vcmp.eq.s32.totalorder %v96_v53, %v48_v38 }
  0xb8   :  { %v93_v54 = vadd.f32 %v231_v52, %v86_v51  ;;  %v232_v55 = vsel %vm97_vm7, 1.0, %v422_v31 }
  0xba   :  { %v100_v57 = vadd.f32 %v232_v55, %v93_v54 }
  0xbb   :  { %v103_v56 = vpop.permute.xlu1 %102 }
  0xbc   :  { %vm104_vm8 = vcmp.eq.s32.totalorder %v103_v56, %v48_v38 }
  0xbd   :  { %v233_v58 = vsel %vm104_vm8, 1.0, %v422_v31 }
  0xbe   :  { %v107_v59 = vadd.f32 %v233_v58, %v100_v57 }
  0xc0   :  { %285 = vmatmul.mubr.f32.vlgmr.msra.gmra.mrb[0].mxu0 %v107_v59 }
 0x193   :  { %v191_v61 = vpop.f32.mrb[0].mxu0 }
 0x194   :  { %v208_v62 = vadd.f32 %v234_v60, %v191_v61  ;;  %v286_v63 = vpop.f32.mrb[1].mxu0 }
 0x196   :  { %209 = vst [vmem:[#allocation8] sm:$0xff] %v208_v62 }
 0x197   :  { %391 = shalt.err (!%p388_p6)
}
 0x198   :  { %s392_s16 = scalar_lea.hbm %s501_s3, 128 }
 0x199   :  { %p393_p7 = scmp.ne.s32.totalorder %s501_s3, %s392_s16  ;;  %p396_p8 = scmp.lt.u32.totalorder %s392_s16, %s501_s3 }
 0x19b   :  { %p398_p9 = pnand %p396_p8, %p393_p7 }
 0x19d   :  { %401 = shalt.err (!%p398_p9)
}
 0x19e   :  { %219 = dma.vmem_to_hbm [thread:$0]  %s217_s12, 128, %s501_s3, [#allocation5]  }
 0x19f   :  { %406 = dma.done.wait [#allocation5], 128  }
 0x1a0   :  { %407 = vsyncadd [#allocation5], 4294967168 }
 0x1a1   :  { %223 = vsyncpa [#allocation4], 1 }
 0x1a2   :  { %224 = vsyncpa [#allocation7], 1 }
 0x1a3   :  { %225 = vsyncpa [#allocation5], 1 }

</bundles_post_ra>
